<compile_context>
chip_gen: v7x
topology: tpu7x:2x2x1
jax: 0.10.0
libtpu: 0.0.40
codegen_flags: <defaults>
</compile_context>

<pallas_src>
import math

import jax
import jax.numpy as jnp
from jax.experimental import pallas as pl
from jax.experimental.pallas import tpu as pltpu


def _disc_kernel(node_ref, ws_ref, b_ref, out_ref):
    node = node_ref[...]                      # (TILE_N, n_in)  f32 or bf16
    ws = ws_ref[...]                          # (1, n_in)       same dtype (= W @ S)
    # Contract the feature (lane) axis of both operands (standard "q @ k.T"
    # pattern); result is lane-dense (1, TILE_N): node index on the lane axis.
    score = jax.lax.dot_general(
        ws, node, dimension_numbers=(((1,), (1,)), ((), ())),
        preferred_element_type=jnp.float32)   # (1, TILE_N) f32
    out_ref[...] = jax.nn.sigmoid(score + b_ref[0])


def _disc_kernel_sbias(node_ref, ws_ref, sb_ref, b_ref, out_ref):
    node = node_ref[...]                      # (TILE_N, n_in)
    ws = ws_ref[...]                          # (1, n_in)
    score = jax.lax.dot_general(
        ws, node, dimension_numbers=(((1,), (1,)), ((), ())),
        preferred_element_type=jnp.float32)   # (1, TILE_N)
    out_ref[...] = jax.nn.sigmoid(score + b_ref[0] + sb_ref[...])


def _round_up(x, m):
    return ((x + m - 1) // m) * m


def _pick_tile_n(n_in, n_rows, itemsize):
    """Row tile: multiple of 128 (lane-dense output).

    VMEM accounting uses the lane-padded row footprint (ceil(n_in/128)*128 *
    itemsize) and the x2 from BlockSpec double-buffering: ~8 MiB per node
    buffer (16 MiB total), safely under the 32 MiB scoped limit on every
    generation (v5e/v6e: 128 MiB physical, v7x: 64 MiB per TC).
    """
    padded_row_bytes = _round_up(max(1, n_in), 128) * itemsize
    per_buffer_budget = 8 * 1024 * 1024
    t = per_buffer_budget // padded_row_bytes
    t = max(128, min(32768, (t // 128) * 128))
    # Keep a few row tiles when there is enough work so the "parallel" grid
    # axis can still shard across v7x's two TensorCores.
    quarter = _round_up(max(1, pl.cdiv(n_rows, 4)), 128)
    return min(t, max(128, quarter))


def discriminator_forward(S, node, weight, bias, s_bias=None, tile_n=None):
    """Pallas equivalent of Discriminator.forward.

    S:      (n_out,) or (1, n_out) summary vector
    node:   (N, n_in) node embeddings (float32 or bfloat16)
    weight: (n_in, n_out)  -- nn.Bilinear weight[0]
    bias:   scalar         -- nn.Bilinear bias[0]
    s_bias: optional (N,) additive bias before the sigmoid
    Returns (N,) float32 sigmoid scores.
    """
    node = jnp.asarray(node)
    if node.dtype.name not in ("float32", "bfloat16"):
        node = node.astype(jnp.float32)       # keep caller-supplied bf16; never downcast here
    N, n_in = node.shape
    S_vec = jnp.asarray(S, jnp.float32).reshape(-1)
    n_out = S_vec.shape[0]
    weight = jnp.asarray(weight, jnp.float32).reshape(n_in, n_out)
    bias_arr = jnp.asarray(bias, jnp.float32).reshape(1)

    # Hoist the tiny bilinear contraction to the wrapper (shared by all rows,
    # since S.expand_as(node) just replicates S); match node's dtype for the MXU.
    ws = jnp.dot(weight, S_vec).reshape(1, n_in).astype(node.dtype)   # (1, n_in)

    if tile_n is None:
        tile_n = _pick_tile_n(n_in, N, node.dtype.itemsize)
    grid = (pl.cdiv(N, tile_n),)              # ragged last block handled by Pallas

    compiler_params = pltpu.CompilerParams(
        dimension_semantics=("parallel",),    # shard row tiles across v7x's 2 TCs
        vmem_limit_bytes=32 * 1024 * 1024,    # explicit; safe on v5e/v6e/v7x
    )

    node_spec = pl.BlockSpec((tile_n, n_in), lambda i: (i, 0))
    ws_spec = pl.BlockSpec((1, n_in), lambda i: (0, 0))
    bias_spec = pl.BlockSpec(memory_space=pltpu.SMEM)
    out_spec = pl.BlockSpec((1, tile_n), lambda i: (0, i))   # lane-dense output
    out_shape = jax.ShapeDtypeStruct((1, N), jnp.float32)

    if s_bias is None:
        out = pl.pallas_call(
            _disc_kernel,
            grid=grid,
            in_specs=[node_spec, ws_spec, bias_spec],
            out_specs=out_spec,
            out_shape=out_shape,
            compiler_params=compiler_params,
        )(node, ws, bias_arr)
    else:
        sb = jnp.asarray(s_bias, jnp.float32).reshape(1, N)
        sb_spec = pl.BlockSpec((1, tile_n), lambda i: (0, i))
        out = pl.pallas_call(
            _disc_kernel_sbias,
            grid=grid,
            in_specs=[node_spec, ws_spec, sb_spec, bias_spec],
            out_specs=out_spec,
            out_shape=out_shape,
            compiler_params=compiler_params,
        )(node, ws, sb, bias_arr)

    return out[0]


def init_discriminator_params(key, n_in, n_out):
    """Matches the PyTorch module: xavier_uniform_ on the (1, n_in, n_out)
    bilinear weight (fan_in = n_in*n_out, fan_out = n_out), zero bias."""
    fan_in = n_in * n_out
    fan_out = n_out
    bound = math.sqrt(3.0) * math.sqrt(2.0 / (fan_in + fan_out))
    weight = jax.random.uniform(key, (n_in, n_out), jnp.float32, -bound, bound)
    bias = jnp.zeros((), jnp.float32)
    return weight, bias


if __name__ == "__main__":
    key = jax.random.PRNGKey(0)
    k_w, k_node, k_s, k_sb = jax.random.split(key, 4)

    # Small shapes: 200 graph nodes, hidden dim 32; tile_n=128 exercises a
    # multi-tile grid with a ragged 72-row edge block (no wrapper-side pad).
    N, n_h = 200, 32
    weight, bias = init_discriminator_params(k_w, n_h, n_h)
    node = jax.random.normal(k_node, (N, n_h), jnp.float32)   # node embeddings
    S = jax.random.normal(k_s, (n_h,), jnp.float32)           # graph summary
    s_bias = 0.1 * jax.random.normal(k_sb, (N,), jnp.float32)

    scores = discriminator_forward(S, node, weight, bias, tile_n=128)
    scores_sb = discriminator_forward(S, node, weight, bias, s_bias=s_bias,
                                      tile_n=128)
    scores_auto = discriminator_forward(S, node, weight, bias)   # auto tile
    scores_bf16 = discriminator_forward(S, node.astype(jnp.bfloat16), weight,
                                        bias, tile_n=128)        # bf16 streaming path
    jax.block_until_ready((scores, scores_sb, scores_auto, scores_bf16))

    # Pure-JAX reference of the bilinear + sigmoid semantics.
    logit = jnp.einsum("ni,ij,j->n", node, weight, S) + bias
    ref = jax.nn.sigmoid(logit)
    ref_sb = jax.nn.sigmoid(logit + s_bias)

    assert scores.shape == (N,)
    assert jnp.allclose(scores, ref, atol=1e-5, rtol=1e-5), (scores, ref)
    assert jnp.allclose(scores_sb, ref_sb, atol=1e-5, rtol=1e-5), (scores_sb, ref_sb)
    assert jnp.allclose(scores_auto, ref, atol=1e-5, rtol=1e-5), (scores_auto, ref)
    assert jnp.allclose(scores_bf16, ref, atol=3e-2, rtol=3e-2), (scores_bf16, ref)

    print("KERNEL_OK")
</pallas_src>

<mosaic_0001>
module attributes {stable_mosaic.version = 11 : i64} {
  func.func @_disc_kernel(%arg0: i32, %arg1: memref<128x32xf32, #tpu.memory_space<vmem>>, %arg2: memref<1x32xf32, #tpu.memory_space<vmem>>, %arg3: memref<1xf32, #tpu.memory_space<smem>>, %arg4: memref<1x128xf32, #tpu.memory_space<vmem>>) attributes {dimension_semantics = [#tpu.dimension_semantics<parallel>], iteration_bounds = array<i64: 2>, scalar_prefetch = 0 : i64, scratch_operands = 0 : i64, tpu.core_type = #tpu.core_type<tc>, window_params = [{transform_indices = @transform_0, window_bounds = array<i64: 128, 32>}, {pipeline_mode = #tpu.pipeline_mode<synchronous>, transform_indices = @transform_1, window_bounds = array<i64: 1, 32>}, {transform_indices = @transform_2, window_bounds = array<i64: 1>}, {transform_indices = @transform_3, window_bounds = array<i64: 1, 128>}]} {
    %c0 = arith.constant 0 : index
    %c0_0 = arith.constant 0 : index
    %0 = vector.load %arg1[%c0, %c0_0] : memref<128x32xf32, #tpu.memory_space<vmem>>, vector<128x32xf32>
    %c0_1 = arith.constant 0 : index
    %c0_2 = arith.constant 0 : index
    %1 = vector.load %arg2[%c0_1, %c0_2] : memref<1x32xf32, #tpu.memory_space<vmem>>, vector<1x32xf32>
    %cst = arith.constant dense<0.000000e+00> : vector<1x128xf32>
    %2 = tpu.matmul %1, %0, %cst {dimension_numbers = #tpu.dot_dimension_numbers<[1], [1], [0], [0], [0, 0, 1, 0], [], []>} : vector<1x32xf32>, vector<128x32xf32>, vector<1x128xf32> -> vector<1x128xf32>
    %c0_3 = arith.constant 0 : index
    %3 = memref.load %arg3[%c0_3] : memref<1xf32, #tpu.memory_space<smem>>
    %4 = vector.broadcast %3 : f32 to vector<1x128xf32>
    %5 = arith.addf %2, %4 : vector<1x128xf32>
    %6 = arith.negf %5 : vector<1x128xf32>
    %7 = math.exp %6 : vector<1x128xf32>
    %cst_4 = arith.constant 1.000000e+00 : f32
    %8 = vector.broadcast %cst_4 : f32 to vector<1x128xf32>
    %9 = arith.addf %8, %7 : vector<1x128xf32>
    %10 = arith.divf %8, %9 : vector<1x128xf32>
    %c0_5 = arith.constant 0 : index
    %c0_6 = arith.constant 0 : index
    %11 = vector.load %arg4[%c0_5, %c0_6] : memref<1x128xf32, #tpu.memory_space<vmem>>, vector<1x128xf32>
    tpu.vector_store %arg4[%c0_5, %c0_6], %10 {strides = array<i32>} : memref<1x128xf32, #tpu.memory_space<vmem>>, vector<1x128xf32>,
    return
  }
  func.func @transform_0(%arg0: i32) -> (i32, i32) {
    %c0_i32 = arith.constant 0 : i32
    %c0_i32_0 = arith.constant 0 : i32
    return %arg0, %c0_i32 : i32, i32
  }
  func.func @transform_1(%arg0: i32) -> (i32, i32) {
    %c0_i32 = arith.constant 0 : i32
    %c0_i32_0 = arith.constant 0 : i32
    %c0_i32_1 = arith.constant 0 : i32
    return %c0_i32, %c0_i32_0 : i32, i32
  }
  func.func @transform_2(%arg0: i32) -> i32 {
    %c0_i32 = arith.constant 0 : i32
    %c0_i32_0 = arith.constant 0 : i32
    return %c0_i32 : i32
  }
  func.func @transform_3(%arg0: i32) -> (i32, i32) {
    %c0_i32 = arith.constant 0 : i32
    %c0_i32_0 = arith.constant 0 : i32
    return %c0_i32, %arg0 : i32, i32
  }
}

</mosaic_0001>

<bundles_post_ra>
// kernel: tpu_custom_call.1
= control target key start
LH: loop header
LB: loop body
LE: loop exit
PB: predicated region body
PF: predicated region fallthrough
CT: control target
= control target key end

     0   :  { %s798_s0 = inlined_call_operand.vmem [shape: f32[200,32], index: 0, kind: input, shape index: {}]   ;;  %s799_s1 = inlined_call_operand.vmem [shape: f32[1,32], index: 1, kind: input, shape index: {}]   ;;  %s800_s2 = inlined_call_operand.<no memory space> [shape: f32[1], index: 2, kind: input, shape index: {}]   ;;  %s801_s3 = inlined_call_operand.hbm [shape: f32[1,200], index: 3, kind: output, shape index: {}]  }
   0x1   :  { %8 = sst [smem:[#allocation2]] %s800_s2 }
   0x2   :  { %9 = vsyncpa [#allocation4], 0 }
   0x3   :  { %11 = vsyncpa [#allocation4 + $0x1], 0  ;;  %s655_s14 = smov 0   ;;  %s657_s15 = smov 0  }
   0x4   :  { %s659_s16 = smov 0   ;;  %s661_s17 = smov 0  }
   0x5 LB: > { %s406_s2 = sadd.s32 4294967295, %s626_s17   ;;  %s407_s18 = sadd.s32 4294967294, %s626_s17   ;;  %s626_s17 = sphi %s661_s17, %s809_s17   ;;  %s622_s16 = sphi %s659_s16, %s808_s16   ;;  %s618_s15 = sphi %s657_s15, %s807_s15   ;;  %s614_s14 = sphi %s655_s14, %s806_s14  }
   0x6   : > { %s678_s19 = sadd.s32 1, %s626_s17   ;;  %s92_s20 = sadd.s32 1, %s622_s16 }
   0x7   : > { %s89_s21 = ssub.s32 %s626_s17, %s678_s19  ;;  %p102_p0 = scmp.ne.s32.totalorder %s622_s16, %s618_s15 }
   0x8   : > { %p90_p1 = scmp.eq.s32.totalorder %s89_s21, 0  ;;  %p103_p2 = scmp.eq.s32.totalorder %s406_s2, 1 }
   0x9   : > { %p108_p3 = scmp.ne.s32.totalorder %s618_s15, %s614_s14  ;;  %p109_p4 = scmp.eq.s32.totalorder %s407_s18, 1 }
   0xa   : > { %s688_s22 = scalar_select %p90_p1, %s622_s16, %s92_s20  }
   0xb   : > { %p690_p5 = por %p103_p2, %p102_p0  ;;  %p694_p6 = por %p109_p4, %p108_p3 }
   0xc   : > { %p410_p7 = scmp.ge.s32.totalorder %s626_s17, 1  ;;  %p150_p8 = scmp.lt.s32.totalorder %s626_s17, 3 }
   0xe   : > { %p151_p9 = pnand %p410_p7, %p150_p8 }
   0xf   : > { %s700_s25 = sshll.u32 (!%p151_p9), %s406_s2, 4  ;;  %v628_v0 = vmov (!%p151_p9), 0.0|0.0   ;;  %vm629_vm0 = vmmov (!%p151_p9), 0   ;;  %v630_v1 = vmov (!%p151_p9), 0.0   ;;  %vm210_vm1 = vcmask (!%p151_p9), 261120   ;;  %s208_s6 = sld [smem:[#allocation2]] (!%p151_p9) }
  0x10   : > { %154 = sbr.rel (%p151_p9) target bundleno = 347 (0x15b), region = 32  ;;  %486 = vmatprep.subr.bf16.mxu0 (!%p151_p9), %v628_v0  ;;  %p182_p10 = scmp.lt.s32.totalorder (!%p151_p9), %s700_s25, 24  ;;  %483 = vmatprep.mubr.msk.f32.mxu0 (!%p151_p9), %vm629_vm0, %v630_v1  ;;  %vm713_vm2 = vmpackc.low (!%p151_p9), %vm210_vm1, %vm210_vm1  ;;  %v207_v27 = vld [vmem:[%s799_s1] sm:$0x1] (!%p151_p9) }
  0x11   : > { %s175_s7 = sand.u32 (!%p151_p9), 1, %s618_s15   ;;  %s756_s12 = scalar_lea.hbm (!%p151_p9), %s801_s3, %s700_s25 }
  0x12   : > { %s176_s8 = scalar_lea.vmem (!%p151_p9), [#allocation3], %s175_s7  ;;  %s340_s13 = scalar_lea.sflag (!%p151_p9), [#allocation4], %s175_s7 }
  0x13   : > { %s352_s9 = sshll.u32 (!%p151_p9), %s176_s8, 4  ;;  %s631_s18 = smov (!%p151_p9), [#allocation3]   ;;  %s758_s9 = int_to_ptr.vmem [resolvable:$true] %s352_s9 }
  0x14   : > { %s564_s2 = scalar_lea.vmem (!%p151_p9), %s758_s9, 16  ;;  %s568_s20 = sshll.u32 (!%p151_p9), %s631_s18, 4  ;;  %s569_s20 = int_to_ptr.vmem [resolvable:$false] %s568_s20 }
  0x15   : > { %v209_v28 = vstv (!%p151_p9), %s208_s6  ;;  %p565_p11 = scmp.ne.s32.totalorder (!%p151_p9), %s758_s9, %s564_s2  ;;  %s570_s21 = scalar_lea.vmem (!%p151_p9), %s569_s20, 32 }
  0x16   : > { %p571_p0 = scmp.lt.s32.totalorder (!%p151_p9), %s758_s9, %s569_s20  ;;  %p572_p1 = scmp.lt.s32.totalorder (!%p151_p9), %s570_s21, %s564_s2 }
  0x17   : > { %s183_s26 = scalar_select %p182_p10, %s700_s25, 24 }
  0x18   : > { %p566_p12 = pnand %p565_p11, %p690_p5  ;;  %p573_p2 = por %p572_p1, %p571_p0 }
  0x19   : > { %s412_s27 = sshll.u32 %s183_s26, 3 }
  0x1a   : > { %s707_s30 = scalar_lea.vmem %s798_s0, %s412_s27  ;;  %p567_p13 = pneg %p566_p12 }
  0x1b   : > { %v191_v2 = vld [vmem:[%s707_s30] sm:$0xff]  ;;  %v192_v3 = vld [vmem:[%s707_s30 + $0x8] sm:$0xff]  ;;  %v193_v6 = vld [vmem:[%s707_s30 + $0x10] sm:$0xff] }
  0x1c   : > { %v487_v5 = vpack.c.bf16 %v192_v3, %v191_v2  ;;  %v194_v7 = vld [vmem:[%s707_s30 + $0x18] sm:$0xff]  ;;  %v195_v9 = vld [vmem:[%s707_s30 + $0x20] sm:$0xff]  ;;  %v196_v10 = vld [vmem:[%s707_s30 + $0x28] sm:$0xff]  ;;  %p574_p3 = pnand %p573_p2, %p567_p13 }
  0x1d   : > { %v491_v8 = vpack.c.bf16 %v194_v7, %v193_v6  ;;  %v495_v11 = vpack.c.bf16 %v196_v10, %v195_v9  ;;  %v197_v12 = vld [vmem:[%s707_s30 + $0x30] sm:$0xff]  ;;  %v198_v13 = vld [vmem:[%s707_s30 + $0x38] sm:$0xff]  ;;  %v199_v15 = vld [vmem:[%s707_s30 + $0x40] sm:$0xff] }
  0x1e   : > { %489 = vmatpush3.bf16.xpose.msk.msra.mxu0 %vm713_vm2, %v487_v5  ;;  %v499_v14 = vpack.c.bf16 %v198_v13, %v197_v12  ;;  %v200_v16 = vld [vmem:[%s707_s30 + $0x48] sm:$0xff]  ;;  %v201_v18 = vld [vmem:[%s707_s30 + $0x50] sm:$0xff]  ;;  %v202_v19 = vld [vmem:[%s707_s30 + $0x58] sm:$0xff] }
  0x1f   : > { %490 = vmatprep.subr.bf16.mxu0 %v628_v0  ;;  %v503_v17 = vpack.c.bf16 %v200_v16, %v199_v15  ;;  %v507_v20 = vpack.c.bf16 %v202_v19, %v201_v18  ;;  %v203_v21 = vld [vmem:[%s707_s30 + $0x60] sm:$0xff]  ;;  %v204_v22 = vld [vmem:[%s707_s30 + $0x68] sm:$0xff]  ;;  %v205_v24 = vld [vmem:[%s707_s30 + $0x70] sm:$0xff] }
  0x20   : > { %v511_v23 = vpack.c.bf16 %v204_v22, %v203_v21  ;;  %v206_v25 = vld [vmem:[%s707_s30 + $0x78] sm:$0xff] }
  0x21   : > { %v515_v26 = vpack.c.bf16 %v206_v25, %v205_v24 }
  0x26   : > { %493 = vmatpush3.bf16.xpose.msk.msra.mxu0 %vm713_vm2, %v491_v8 }
  0x27   : > { %494 = vmatprep.subr.bf16.mxu0 %v628_v0 }
  0x2e   : > { %497 = vmatpush3.bf16.xpose.msk.msra.mxu0 %vm713_vm2, %v495_v11 }
  0x2f   : > { %498 = vmatprep.subr.bf16.mxu0 %v628_v0 }
  0x36   : > { %501 = vmatpush3.bf16.xpose.msk.msra.mxu0 %vm713_vm2, %v499_v14 }
  0x37   : > { %502 = vmatprep.subr.bf16.mxu0 %v628_v0 }
  0x3e   : > { %505 = vmatpush3.bf16.xpose.msk.msra.mxu0 %vm713_vm2, %v503_v17 }
  0x3f   : > { %506 = vmatprep.subr.bf16.mxu0 %v628_v0 }
  0x46   : > { %509 = vmatpush3.bf16.xpose.msk.msra.mxu0 %vm713_vm2, %v507_v20 }
  0x47   : > { %510 = vmatprep.subr.bf16.mxu0 %v628_v0 }
  0x4e   : > { %513 = vmatpush3.bf16.xpose.msk.msra.mxu0 %vm713_vm2, %v511_v23 }
  0x4f   : > { %514 = vmatprep.subr.bf16.mxu0 %v628_v0 }
  0x56   : > { %517 = vmatpush3.bf16.xpose.msk.msra.mxu0 %vm713_vm2, %v515_v26 }
  0x5d   : > { %484 = vmatmul.mubr.msk.f32.vlgmr.msra.gmra.mrb[0].mxu0 %vm210_vm1, %v207_v27 }
 0x130   : > { %v328_v29 = vpop.f32.mrb[0].mxu0 }
 0x131   : > { %v329_v30 = vadd.f32 %v328_v29, %v209_v28  ;;  %v485_v31 = vpop.f32.mrb[1].mxu0 }
 0x133   : > { %v430_v32 = vmul.f32 -1.442695, %v329_v30 }
 0x135   : > { %560 = vpow2.f32 %v430_v32 }
 0x13f   : > { %v561_v33 = vpop.eup %560 }
 0x140   : > { %v335_v34 = vadd.f32 1.0, %v561_v33 }
 0x142   : > { %562 = vrcp.f32 %v335_v34 }
 0x14c   : > { %v563_v35 = vpop.eup %562 }
 0x14d   : > { %338 = vst [vmem:[%s176_s8] sm:$0x1] %v563_v35 }
 0x14e   : > { %577 = shalt.err (!%p574_p3)
}
 0x14f   : > { %s578_s25 = scalar_lea.hbm %s756_s12, 16  ;;  %s582_s28 = scalar_lea.hbm %s801_s3, 32 }
 0x150   : > { %p579_p4 = scmp.ne.s32.totalorder %s756_s12, %s578_s25  ;;  %p583_p9 = scmp.lt.u32.totalorder %s756_s12, %s801_s3 }
 0x151   : > { %p584_p10 = scmp.lt.u32.totalorder %s582_s28, %s578_s25  ;;  %p586_p12 = scmp.lt.u32.totalorder %s578_s25, %s756_s12 }
 0x152   : > { %p580_p7 = pnand %p579_p4, %p690_p5 }
 0x153   : > { %p585_p11 = por %p584_p10, %p583_p9 }
 0x154   : > { %p581_p8 = pneg %p580_p7 }
 0x155   : > { %p587_p13 = por %p586_p12, %p585_p11 }
 0x157   : > { %p588_p0 = pnand %p587_p13, %p581_p8 }
 0x159   : > { %591 = shalt.err (!%p588_p0)
}
 0x15a   : > { %518 = dma.vmem_to_hbm [thread:$0]  (%p690_p5), %s758_s9, 16, %s756_s12, %s340_s13  }
 0x15b PF: > { %p524_p1 = scmp.ge.s32.totalorder %s626_s17, 2  ;;  %s364_s4 = sand.u32 1, %s614_s14  }
 0x15c   : > { %s365_s5 = scalar_lea.sflag [#allocation4], %s364_s4 }
 0x15d   : > { %p521_p2 = pnand %p524_p1, %p694_p6 }
 0x15f   : > { %609 = dma.done.wait (!%p521_p2), %s365_s5, 16  }
 0x160   : > { %611 = vsyncadd (!%p521_p2), %s365_s5, 4294967280  ;;  %p14_p3 = scmp.ge.s32.totalorder %s678_s19, 4   ;;  %s806_s14 = smov %s618_s15 }
 0x161   : > { %s807_s15 = smov %s622_s16  ;;  %s808_s16 = smov %s688_s22 }
 0x162   : > { %s809_s17 = smov %s678_s19  ;;  %16 = sbr.rel (!%p14_p3) target bundleno = 5 (0x5), region = 67 }
 0x169   :  { %369 = vsyncpa [#allocation4], 1 }
 0x16a   :  { %371 = vsyncpa [#allocation4 + $0x1], 1 }

</bundles_post_ra>
